<compile_context>
chip_gen: v6e
topology: v6e:2x2x1
jax: 0.10.0
libtpu: 0.0.40
codegen_flags: <defaults>
</compile_context>

<pallas_src>
import jax
import jax.numpy as jnp
from jax.experimental import pallas as pl
from jax.experimental.pallas import tpu as pltpu

IN_FEATURES = 784
HIDDEN = 64
OUT_FEATURES = 10
LEAKY_SLOPE = 0.01  # PyTorch nn.LeakyReLU default negative_slope

HIDDEN_PAD = 128    # lane-dense hidden width
OUT_PAD = 128       # lane-dense output width
MAX_TB = 1024       # max batch tile (fits easily in VMEM on v5e/v6e/v7x)


def _round_up(x, m):
    return ((x + m - 1) // m) * m


# ---------------------------------------------------------------------------
# Kernel
# ---------------------------------------------------------------------------
def _mlp_kernel(x_ref, w1_ref, b1_ref, w2_ref, b2_ref, o_ref):
    # x: (TB, 784) f32, w1: (784, 128) bf16, b1: (1, 128) f32,
    # w2: (128, 128) bf16, b2: (1, 128) f32, o: (TB, 128) f32
    x = x_ref[...].astype(jnp.bfloat16)  # cast in-kernel; hides under the MXU
    h = jnp.dot(x, w1_ref[...], preferred_element_type=jnp.float32) + b1_ref[...]
    # LeakyReLU(0.01): single vmax (== where(h>0, h, 0.01*h) for finite h)
    h = jnp.maximum(h, LEAKY_SLOPE * h)
    logits = (
        jnp.dot(h.astype(jnp.bfloat16), w2_ref[...],
                preferred_element_type=jnp.float32)
        + b2_ref[...]
    )
    o_ref[...] = logits.astype(o_ref.dtype)


# ---------------------------------------------------------------------------
# One-time parameter preparation (hoisted out of the per-call path)
# ---------------------------------------------------------------------------
def prepare_params(w1, b1, w2, b2):
    """Zero-pad to lane-dense widths and cast weights to bf16. Call once.

    Padded hidden columns of w1 are zero -> h_pad = 0 and leaky(0) = 0;
    padded rows of w2 are zero -> they contribute nothing to the logits.
    """
    w1_p = jnp.zeros((IN_FEATURES, HIDDEN_PAD), jnp.float32).at[:, :HIDDEN].set(w1)
    b1_p = jnp.zeros((1, HIDDEN_PAD), jnp.float32).at[:, :HIDDEN].set(b1)
    w2_p = (
        jnp.zeros((HIDDEN_PAD, OUT_PAD), jnp.float32)
        .at[:HIDDEN, :OUT_FEATURES]
        .set(w2)
    )
    b2_p = jnp.zeros((1, OUT_PAD), jnp.float32).at[:, :OUT_FEATURES].set(b2)
    return (w1_p.astype(jnp.bfloat16), b1_p, w2_p.astype(jnp.bfloat16), b2_p)


# ---------------------------------------------------------------------------
# Batch tiling choice
# ---------------------------------------------------------------------------
def _choose_batch_tiling(B):
    """Return (tb, Bp): batch tile size and padded batch.

    Large tiles to amortize per-grid-step overhead, <~10% padding waste, and
    >= 2 tiles for big batches so the "parallel" axis shards across both
    TensorCores on v7x.
    """
    Bp = _round_up(B, 8)          # f32 sublane multiple
    if Bp <= 256:
        return Bp, Bp             # single small tile

    tb, padded = 128, _round_up(Bp, 128)
    for cand in (MAX_TB, 512, 256, 128):
        p = _round_up(Bp, cand)
        if (p - Bp) / p <= 0.10:  # padding waste cap
            tb, padded = cand, p
            break

    # Guarantee >= 2 tiles so the parallel axis can use both v7x TensorCores.
    if padded // tb == 1 and tb > 256:
        tb //= 2                  # padded stays divisible by tb
    return tb, padded


# ---------------------------------------------------------------------------
# Forward pass
# ---------------------------------------------------------------------------
def nn_forward(x_nchw, prepared_params):
    """Forward pass of the NN module.

    Args:
      x_nchw: (B, ...) float32 with prod(trailing dims) == 784, e.g. (B,1,28,28).
      prepared_params: output of prepare_params(w1, b1, w2, b2).
    Returns:
      logits: (B, 10) float32
    """
    w1_bf, b1_p, w2_bf, b2_p = prepared_params

    B = x_nchw.shape[0]
    x = x_nchw.reshape(B, -1)     # nn.Flatten: flatten all dims except batch
    assert x.shape[1] == IN_FEATURES

    tb, Bp = _choose_batch_tiling(B)
    if Bp != B:
        x = jnp.pad(x, ((0, Bp - B), (0, 0)))

    grid = (Bp // tb,)

    out = pl.pallas_call(
        _mlp_kernel,
        out_shape=jax.ShapeDtypeStruct((Bp, OUT_PAD), jnp.float32),
        grid=grid,
        in_specs=[
            pl.BlockSpec((tb, IN_FEATURES), lambda i: (i, 0)),          # x tile (f32)
            pl.BlockSpec((IN_FEATURES, HIDDEN_PAD), lambda i: (0, 0)),  # w1 resident
            pl.BlockSpec((1, HIDDEN_PAD), lambda i: (0, 0)),            # b1 resident
            pl.BlockSpec((HIDDEN_PAD, OUT_PAD), lambda i: (0, 0)),      # w2 resident
            pl.BlockSpec((1, OUT_PAD), lambda i: (0, 0)),               # b2 resident
        ],
        out_specs=pl.BlockSpec((tb, OUT_PAD), lambda i: (i, 0)),
        compiler_params=pltpu.CompilerParams(
            dimension_semantics=("parallel",),  # batch tiles shard across TCs on v7x
        ),
    )(x, w1_bf, b1_p, w2_bf, b2_p)

    return out[:B, :OUT_FEATURES]


# ---------------------------------------------------------------------------
# Init (matches torch.nn.Linear default: U(-1/sqrt(fan_in), 1/sqrt(fan_in)))
# ---------------------------------------------------------------------------
def init_params(key):
    k1, k2, k3, k4 = jax.random.split(key, 4)
    bound1 = 1.0 / jnp.sqrt(IN_FEATURES)
    bound2 = 1.0 / jnp.sqrt(HIDDEN)
    w1 = jax.random.uniform(k1, (IN_FEATURES, HIDDEN), jnp.float32, -bound1, bound1)
    b1 = jax.random.uniform(k2, (HIDDEN,), jnp.float32, -bound1, bound1)
    w2 = jax.random.uniform(k3, (HIDDEN, OUT_FEATURES), jnp.float32, -bound2, bound2)
    b2 = jax.random.uniform(k4, (OUT_FEATURES,), jnp.float32, -bound2, bound2)
    return w1, b1, w2, b2


if __name__ == "__main__":
    key = jax.random.PRNGKey(0)
    k_params, k_x = jax.random.split(key)
    w1, b1, w2, b2 = init_params(k_params)
    prepared = prepare_params(w1, b1, w2, b2)   # one-time weight prep

    # Small MNIST-like batch: (B, C, H, W) = (8, 1, 28, 28) -> 784 features.
    x = jax.random.normal(k_x, (8, 1, 28, 28), dtype=jnp.float32)

    logits = nn_forward(x, prepared)
    logits = jax.block_until_ready(logits)
    assert logits.shape == (8, 10)

    # Reference 1: same math with the same bf16-weights / f32-accumulate recipe.
    xf = x.reshape(x.shape[0], -1)
    xb = xf.astype(jnp.bfloat16)
    w1b = w1.astype(jnp.bfloat16)
    w2b = w2.astype(jnp.bfloat16)
    h_ref = jnp.dot(xb, w1b, preferred_element_type=jnp.float32) + b1
    h_ref = jnp.maximum(h_ref, LEAKY_SLOPE * h_ref)
    ref_bf = jnp.dot(h_ref.astype(jnp.bfloat16), w2b,
                     preferred_element_type=jnp.float32) + b2
    assert jnp.allclose(logits, ref_bf, atol=1e-3, rtol=1e-3)

    # Reference 2: full-f32 PyTorch-equivalent math (loose tolerance for bf16).
    h32 = xf @ w1 + b1
    h32 = jnp.where(h32 > 0, h32, LEAKY_SLOPE * h32)
    ref_f32 = h32 @ w2 + b2
    assert jnp.allclose(logits, ref_f32, atol=5e-2, rtol=5e-2)

    print("KERNEL_OK")
</pallas_src>

<mosaic_0001>
module attributes {stable_mosaic.version = 11 : i64} {
  func.func @_mlp_kernel(%arg0: i32, %arg1: memref<8x784xf32, #tpu.memory_space<vmem>>, %arg2: memref<784x128xbf16, #tpu.memory_space<vmem>>, %arg3: memref<1x128xf32, #tpu.memory_space<vmem>>, %arg4: memref<128x128xbf16, #tpu.memory_space<vmem>>, %arg5: memref<1x128xf32, #tpu.memory_space<vmem>>, %arg6: memref<8x128xf32, #tpu.memory_space<vmem>>) attributes {dimension_semantics = [#tpu.dimension_semantics<parallel>], iteration_bounds = array<i64: 1>, scalar_prefetch = 0 : i64, scratch_operands = 0 : i64, tpu.core_type = #tpu.core_type<tc>, window_params = [{transform_indices = @transform_0, window_bounds = array<i64: 8, 784>}, {pipeline_mode = #tpu.pipeline_mode<synchronous>, transform_indices = @transform_1, window_bounds = array<i64: 784, 128>}, {pipeline_mode = #tpu.pipeline_mode<synchronous>, transform_indices = @transform_2, window_bounds = array<i64: 1, 128>}, {pipeline_mode = #tpu.pipeline_mode<synchronous>, transform_indices = @transform_3, window_bounds = array<i64: 128, 128>}, {pipeline_mode = #tpu.pipeline_mode<synchronous>, transform_indices = @transform_4, window_bounds = array<i64: 1, 128>}, {transform_indices = @transform_5, window_bounds = array<i64: 8, 128>}]} {
    %c0 = arith.constant 0 : index
    %c0_0 = arith.constant 0 : index
    %0 = vector.load %arg1[%c0, %c0_0] : memref<8x784xf32, #tpu.memory_space<vmem>>, vector<8x784xf32>
    %1 = arith.truncf %0 : vector<8x784xf32> to vector<8x784xbf16>
    %c0_1 = arith.constant 0 : index
    %c0_2 = arith.constant 0 : index
    %2 = vector.load %arg2[%c0_1, %c0_2] : memref<784x128xbf16, #tpu.memory_space<vmem>>, vector<784x128xbf16>
    %cst = arith.constant dense<0.000000e+00> : vector<8x128xf32>
    %3 = tpu.matmul %1, %2, %cst {dimension_numbers = #tpu.dot_dimension_numbers<[1], [0], [0], [1], [0, 0, 1, 1], [], []>} : vector<8x784xbf16>, vector<784x128xbf16>, vector<8x128xf32> -> vector<8x128xf32>
    %c0_3 = arith.constant 0 : index
    %c0_4 = arith.constant 0 : index
    %4 = vector.load %arg3[%c0_3, %c0_4] : memref<1x128xf32, #tpu.memory_space<vmem>>, vector<1x128xf32>
    %5 = vector.broadcast %4 : vector<1x128xf32> to vector<8x128xf32>
    %6 = arith.addf %3, %5 : vector<8x128xf32>
    %cst_5 = arith.constant 0.00999999977 : f32
    %7 = vector.broadcast %cst_5 : f32 to vector<8x128xf32>
    %8 = arith.mulf %7, %6 : vector<8x128xf32>
    %9 = arith.maximumf %6, %8 : vector<8x128xf32>
    %10 = arith.truncf %9 : vector<8x128xf32> to vector<8x128xbf16>
    %c0_6 = arith.constant 0 : index
    %c0_7 = arith.constant 0 : index
    %11 = vector.load %arg4[%c0_6, %c0_7] : memref<128x128xbf16, #tpu.memory_space<vmem>>, vector<128x128xbf16>
    %cst_8 = arith.constant dense<0.000000e+00> : vector<8x128xf32>
    %12 = tpu.matmul %10, %11, %cst_8 {dimension_numbers = #tpu.dot_dimension_numbers<[1], [0], [0], [1], [0, 0, 1, 1], [], []>} : vector<8x128xbf16>, vector<128x128xbf16>, vector<8x128xf32> -> vector<8x128xf32>
    %c0_9 = arith.constant 0 : index
    %c0_10 = arith.constant 0 : index
    %13 = vector.load %arg5[%c0_9, %c0_10] : memref<1x128xf32, #tpu.memory_space<vmem>>, vector<1x128xf32>
    %14 = vector.broadcast %13 : vector<1x128xf32> to vector<8x128xf32>
    %15 = arith.addf %12, %14 : vector<8x128xf32>
    %c0_11 = arith.constant 0 : index
    %c0_12 = arith.constant 0 : index
    %16 = vector.load %arg6[%c0_11, %c0_12] : memref<8x128xf32, #tpu.memory_space<vmem>>, vector<8x128xf32>
    tpu.vector_store %arg6[%c0_11, %c0_12], %15 {strides = array<i32>} : memref<8x128xf32, #tpu.memory_space<vmem>>, vector<8x128xf32>,
    return
  }
  func.func @transform_0(%arg0: i32) -> (i32, i32) {
    %c0_i32 = arith.constant 0 : i32
    %c0_i32_0 = arith.constant 0 : i32
    return %arg0, %c0_i32 : i32, i32
  }
  func.func @transform_1(%arg0: i32) -> (i32, i32) {
    %c0_i32 = arith.constant 0 : i32
    %c0_i32_0 = arith.constant 0 : i32
    %c0_i32_1 = arith.constant 0 : i32
    return %c0_i32, %c0_i32_0 : i32, i32
  }
  func.func @transform_2(%arg0: i32) -> (i32, i32) {
    %c0_i32 = arith.constant 0 : i32
    %c0_i32_0 = arith.constant 0 : i32
    %c0_i32_1 = arith.constant 0 : i32
    return %c0_i32, %c0_i32_0 : i32, i32
  }
  func.func @transform_3(%arg0: i32) -> (i32, i32) {
    %c0_i32 = arith.constant 0 : i32
    %c0_i32_0 = arith.constant 0 : i32
    %c0_i32_1 = arith.constant 0 : i32
    return %c0_i32, %c0_i32_0 : i32, i32
  }
  func.func @transform_4(%arg0: i32) -> (i32, i32) {
    %c0_i32 = arith.constant 0 : i32
    %c0_i32_0 = arith.constant 0 : i32
    %c0_i32_1 = arith.constant 0 : i32
    return %c0_i32, %c0_i32_0 : i32, i32
  }
  func.func @transform_5(%arg0: i32) -> (i32, i32) {
    %c0_i32 = arith.constant 0 : i32
    %c0_i32_0 = arith.constant 0 : i32
    return %arg0, %c0_i32 : i32, i32
  }
}

</mosaic_0001>

<bundles_post_ra>
// kernel: tpu_custom_call.1
= control target key start
LH: loop header
LB: loop body
LE: loop exit
PB: predicated region body
PF: predicated region fallthrough
CT: control target
= control target key end

     0   :  { %10 = vsyncpa [#allocation3], 0  ;;  %s1152_s0 = inlined_call_operand.hbm [shape: f32[8,784], index: 0, kind: input, shape index: {}]   ;;  %s1153_s1 = inlined_call_operand.hbm [shape: bf16[784,128], index: 1, kind: input, shape index: {}]   ;;  %s1154_s2 = inlined_call_operand.vmem [shape: f32[1,128], index: 2, kind: input, shape index: {}]   ;;  %s1155_s3 = inlined_call_operand.hbm [shape: bf16[128,128], index: 3, kind: input, shape index: {}]   ;;  %s1156_s4 = inlined_call_operand.vmem [shape: f32[1,128], index: 4, kind: input, shape index: {}]   ;;  %s1157_s5 = inlined_call_operand.hbm [shape: f32[8,128], index: 5, kind: output, shape index: {}]  }
   0x1   :  { %11 = vsyncpa [#allocation6], 0 }
   0x2   :  { %12 = vsyncpa [#allocation4], 0  ;;  %s1083_s18 = smov [#allocation5]  }
   0x3   :  { %s28_s19 = sshll.u32 %s1083_s18, 4  ;;  %s29_s19 = int_to_ptr.vmem [resolvable:$true] %s28_s19 }
   0x4   :  { %s1005_s20 = scalar_lea.vmem %s29_s19, 6272  ;;  %p1010_p1 = scmp.lt.s32.totalorder %s29_s19, %s29_s19 }
   0x5   :  { %p1006_p0 = scmp.ne.s32.totalorder %s29_s19, %s1005_s20  ;;  %p1011_p2 = scmp.lt.s32.totalorder %s1005_s20, %s1005_s20 }
   0x7   :  { %p1012_p3 = por %p1011_p2, %p1010_p1 }
   0x9   :  { %p1013_p4 = pnand %p1012_p3, %p1006_p0 }
   0xb   :  { %1016 = shalt.err (!%p1013_p4)
}
   0xc   :  { %s1084_s21 = smov 64   ;;  %s1085_s22 = smov 4  }
   0xd   :  { %34 = dma.hbm_to_vmem [thread:$0]  %s1153_s1, 6272, %s29_s19, [#allocation6], %s1084_s21, %s1084_s21, %s1085_s22  }
   0xe   :  { %s1086_s25 = smov [#allocation2]   ;;  %s1087_s27 = smov [#allocation7]  }
   0xf   :  { %s19_s26 = sshll.u32 %s1086_s25, 4  ;;  %s42_s28 = sshll.u32 %s1087_s27, 4  ;;  %s20_s26 = int_to_ptr.vmem [resolvable:$true] %s19_s26  ;;  %s43_s28 = int_to_ptr.vmem [resolvable:$true] %s42_s28 }
  0x10   :  { %s1025_s29 = scalar_lea.vmem %s20_s26, 896  ;;  %p1030_p6 = scmp.lt.s32.totalorder %s20_s26, %s20_s26 }
  0x11   :  { %p1026_p5 = scmp.ne.s32.totalorder %s20_s26, %s1025_s29  ;;  %p1031_p7 = scmp.lt.s32.totalorder %s1025_s29, %s1025_s29 }
  0x13   :  { %p1032_p8 = por %p1031_p7, %p1030_p6 }
  0x15   :  { %p1033_p9 = pnand %p1032_p8, %p1026_p5 }
  0x17   :  { %1036 = shalt.err (!%p1033_p9)
}
  0x18   :  { %22 = dma.hbm_to_vmem [thread:$0]  %s1152_s0, 896, %s20_s26, [#allocation3]  }
  0x19   :  { %s1045_s7 = scalar_lea.vmem %s43_s28, 1024  ;;  %p1050_p11 = scmp.lt.s32.totalorder %s43_s28, %s43_s28 }
  0x1a   :  { %p1046_p10 = scmp.ne.s32.totalorder %s43_s28, %s1045_s7  ;;  %p1051_p12 = scmp.lt.s32.totalorder %s1045_s7, %s1045_s7 }
  0x1c   :  { %p1052_p13 = por %p1051_p12, %p1050_p11 }
  0x1e   :  { %p1053_p0 = pnand %p1052_p13, %p1046_p10 }
  0x20   :  { %1056 = shalt.err (!%p1053_p0)
}
  0x21   :  { %48 = dma.hbm_to_vmem [thread:$0]  %s1155_s3, 1024, %s43_s28, [#allocation6], %s1084_s21, %s1084_s21, %s1085_s22  }
  0x22   :  { %1077 = dma.done.wait [#allocation3], 896  }
  0x23   :  { %1078 = vsyncadd [#allocation3], 4294966400 }
  0x24   :  { %1079 = dma.done.wait [#allocation6], 7296  }
  0x25   :  { %1080 = vsyncadd [#allocation6], 4294960000  ;;  %v940_v0 = vld [vmem:[#allocation5 + $0x78] sm:$0xff]   ;;  %v944_v4 = vld [vmem:[#allocation5 + $0x70] sm:$0xff]   ;;  %v1088_v44 = vmov 0.0   ;;  %vm1089_vm0 = vmmov 0  }
  0x26   :  { %v941_v1 = vld [vmem:[#allocation5 + $0x38] sm:$0xff]   ;;  %829 = vmatprep.subr.bf16.mxu0 %v940_v0  ;;  %v945_v5 = vld [vmem:[#allocation5 + $0x30] sm:$0xff]   ;;  %v948_v8 = vld [vmem:[#allocation5 + $0x68] sm:$0xff]   ;;  %vm474_vm1 = vcmask 130048   ;;  %s1090_s11 = smov [#allocation8]  }
  0x27   :  { %v942_v2 = vld [vmem:[#allocation5 + $0xf8] sm:$0xff]   ;;  %830 = vmatpush3.bf16.msra.mxu0 %v941_v1  ;;  %v946_v6 = vld [vmem:[#allocation5 + $0xf0] sm:$0xff]   ;;  %v949_v9 = vld [vmem:[#allocation5 + $0x28] sm:$0xff]  }
  0x28   :  { %v943_v3 = vld [vmem:[#allocation5 + $0xb8] sm:$0xff]   ;;  %851 = vmatprep.subr.bf16.mxu1 %v942_v2  ;;  %831 = vmatprep.subr.bf16.mxu0 %v944_v4  ;;  %v947_v7 = vld [vmem:[#allocation5 + $0xb0] sm:$0xff]   ;;  %v950_v10 = vld [vmem:[#allocation5 + $0xe8] sm:$0xff]  }
  0x29   :  { %852 = vmatpush3.bf16.msra.mxu1 %v943_v3  ;;  %v951_v11 = vld [vmem:[#allocation5 + $0xa8] sm:$0xff]   ;;  %v952_v12 = vld [vmem:[#allocation5 + $0x60] sm:$0xff]   ;;  %v956_v16 = vld [vmem:[#allocation5 + $0x58] sm:$0xff]  }
  0x2a   :  { %853 = vmatprep.subr.bf16.mxu1 %v946_v6  ;;  %v953_v13 = vld [vmem:[#allocation5 + $0x20] sm:$0xff]   ;;  %v957_v17 = vld [vmem:[#allocation5 + $0x18] sm:$0xff]   ;;  %v960_v20 = vld [vmem:[#allocation5 + $0x50] sm:$0xff]  }
  0x2b   :  { %832 = vmatpush3.bf16.msra.mxu0 %v945_v5  ;;  %v954_v14 = vld [vmem:[#allocation5 + $0xe0] sm:$0xff]   ;;  %v958_v18 = vld [vmem:[#allocation5 + $0xd8] sm:$0xff]   ;;  %v961_v21 = vld [vmem:[#allocation5 + $0x10] sm:$0xff]  }
  0x2c   :  { %833 = vmatprep.subr.bf16.mxu0 %v948_v8  ;;  %v955_v15 = vld [vmem:[#allocation5 + $0xa0] sm:$0xff]   ;;  %v959_v19 = vld [vmem:[#allocation5 + $0x98] sm:$0xff]   ;;  %v962_v22 = vld [vmem:[#allocation5 + $0xd0] sm:$0xff]  }
  0x2d   :  { %854 = vmatpush3.bf16.msra.mxu1 %v947_v7  ;;  %v963_v23 = vld [vmem:[#allocation5 + $0x90] sm:$0xff]   ;;  %v964_v24 = vld [vmem:[#allocation5 + $0x48] sm:$0xff]   ;;  %v968_v28 = vld [vmem:[#allocation5 + $0x40] sm:$0xff]  }
  0x2e   :  { %855 = vmatprep.subr.bf16.mxu1 %v950_v10  ;;  %v965_v25 = vld [vmem:[#allocation5 + $0x8] sm:$0xff]   ;;  %v969_v29 = vld [vmem:[#allocation5] sm:$0xff]   ;;  %v62_v31 = vld [vmem:[#allocation2 + $0x8] sm:$0xff] }
  0x2f   :  { %834 = vmatpush3.bf16.msra.mxu0 %v949_v9  ;;  %v966_v26 = vld [vmem:[#allocation5 + $0xc8] sm:$0xff]   ;;  %v970_v30 = vld [vmem:[#allocation5 + $0xc0] sm:$0xff]   ;;  %v69_v32 = vpack.c.bf16 %v62_v31, %v62_v31  ;;  %v972_v36 = vld [vmem:[#allocation5 + $0x178] sm:$0xff]  }
  0x30   :  { %835 = vmatprep.subr.bf16.mxu0 %v952_v12  ;;  %v967_v27 = vld [vmem:[#allocation5 + $0x88] sm:$0xff]   ;;  %v971_v33 = vld [vmem:[#allocation5 + $0x80] sm:$0xff]   ;;  %v973_v39 = vld [vmem:[#allocation5 + $0x138] sm:$0xff]  }
  0x31   :  { %856 = vmatpush3.bf16.msra.mxu1 %v951_v11  ;;  %v61_v34 = vld [vmem:[#allocation2] sm:$0xff]  ;;  %v64_v37 = vld [vmem:[#allocation2 + $0x18] sm:$0xff]  ;;  %510 = vmatprep.mubr.bf16.mxu0 %v69_v32  ;;  %v63_v40 = vld [vmem:[#allocation2 + $0x10] sm:$0xff] }
  0x32   :  { %857 = vmatprep.subr.bf16.mxu1 %v954_v14  ;;  %v68_v35 = vpack.c.bf16 %v61_v34, %v61_v34  ;;  %v71_v38 = vpack.c.bf16 %v64_v37, %v64_v37  ;;  %v70_v41 = vpack.c.bf16 %v63_v40, %v63_v40  ;;  %v974_v42 = vld [vmem:[#allocation5 + $0x170] sm:$0xff]   ;;  %v976_v45 = vld [vmem:[#allocation5 + $0x168] sm:$0xff]   ;;  %v978_v47 = vld [vmem:[#allocation5 + $0x160] sm:$0xff]  }
  0x33   :  { %836 = vmatpush3.bf16.msra.mxu0 %v953_v13  ;;  %v975_v43 = vld [vmem:[#allocation5 + $0x130] sm:$0xff]   ;;  %v977_v46 = vld [vmem:[#allocation5 + $0x128] sm:$0xff]   ;;  %v979_v48 = vld [vmem:[#allocation5 + $0x120] sm:$0xff]  }
  0x34   :  { %837 = vmatprep.subr.bf16.mxu0 %v956_v16  ;;  %550 = vmatprep.mubr.bf16.mxu1 %v71_v38  ;;  %v980_v49 = vld [vmem:[#allocation5 + $0x158] sm:$0xff]   ;;  %v982_v51 = vld [vmem:[#allocation5 + $0x150] sm:$0xff]   ;;  %v988_v53 = vld [vmem:[#allocation5 + $0x180] sm:$0xff]  }
  0x35   :  { %858 = vmatpush3.bf16.msra.mxu1 %v955_v15  ;;  %v981_v50 = vld [vmem:[#allocation5 + $0x118] sm:$0xff]   ;;  %v983_v52 = vld [vmem:[#allocation5 + $0x110] sm:$0xff]   ;;  %v984_v55 = vld [vmem:[#allocation5 + $0x148] sm:$0xff]  }
  0x36   :  { %859 = vmatprep.subr.bf16.mxu1 %v958_v18  ;;  %v66_v54 = vld [vmem:[#allocation2 + $0x28] sm:$0xff]  ;;  %v67_v57 = vld [vmem:[#allocation2 + $0x30] sm:$0xff]  ;;  %v985_v59 = vld [vmem:[#allocation5 + $0x108] sm:$0xff]  }
  0x37   :  { %838 = vmatpush3.bf16.msra.mxu0 %v957_v17  ;;  %v73_v56 = vpack.c.bf16 %v66_v54, %v66_v54  ;;  %v74_v58 = vpack.c.bf16 %v67_v57, %v67_v57  ;;  %v986_v60 = vld [vmem:[#allocation5 + $0x140] sm:$0xff]   ;;  %v65_v62 = vld [vmem:[#allocation2 + $0x20] sm:$0xff]  ;;  %v990_v1 = vld [vmem:[#allocation7 + $0x30] sm:$0xff]  }
  0x38   :  { %839 = vmatprep.subr.bf16.mxu0 %v960_v20  ;;  %v987_v61 = vld [vmem:[#allocation5 + $0x100] sm:$0xff]   ;;  %v72_v63 = vpack.c.bf16 %v65_v62, %v65_v62  ;;  %v991_v2 = vld [vmem:[#allocation7 + $0x28] sm:$0xff]   ;;  %v992_v3 = vld [vmem:[#allocation7 + $0x20] sm:$0xff]  }
  0x39   :  { %860 = vmatpush3.bf16.msra.mxu1 %v959_v19  ;;  %v989_v0 = vld [vmem:[#allocation7 + $0x38] sm:$0xff]   ;;  %v994_v5 = vld [vmem:[#allocation7 + $0x10] sm:$0xff]   ;;  %v995_v6 = vld [vmem:[#allocation7 + $0x8] sm:$0xff]  }
  0x3a   :  { %861 = vmatprep.subr.bf16.mxu1 %v962_v22  ;;  %v993_v4 = vld [vmem:[#allocation7 + $0x18] sm:$0xff]   ;;  %v996_v7 = vld [vmem:[#allocation7] sm:$0xff]  }
  0x3b   :  { %840 = vmatpush3.bf16.msra.mxu0 %v961_v21  ;;  %v769_v21 = vld [vmem:[%s1154_s2] ss:$0 sm:$0xff]  ;;  %s759_s2 = sshll.u32 %s1090_s11, 4  ;;  %s760_s2 = int_to_ptr.vmem [resolvable:$true] %s759_s2 }
  0x3c   :  { %841 = vmatprep.subr.bf16.mxu0 %v964_v24  ;;  %s1057_s12 = scalar_lea.vmem %s760_s2, 128  ;;  %p1062_p2 = scmp.lt.s32.totalorder %s760_s2, %s760_s2 }
  0x3d   :  { %862 = vmatpush3.bf16.msra.mxu1 %v963_v23  ;;  %p1058_p1 = scmp.ne.s32.totalorder %s760_s2, %s1057_s12  ;;  %p1063_p3 = scmp.lt.s32.totalorder %s1057_s12, %s1057_s12 }
  0x3e   :  { %863 = vmatprep.subr.bf16.mxu1 %v966_v26 }
  0x3f   :  { %842 = vmatpush3.bf16.msra.mxu0 %v965_v25  ;;  %p1064_p4 = por %p1063_p3, %p1062_p2 }
  0x40   :  { %843 = vmatprep.subr.bf16.mxu0 %v968_v28 }
  0x41   :  { %864 = vmatpush3.bf16.msra.mxu1 %v967_v27  ;;  %p1065_p5 = pnand %p1064_p4, %p1058_p1 }
  0x42   :  { %865 = vmatprep.subr.bf16.mxu1 %v970_v30 }
  0x43   :  { %844 = vmatpush3.bf16.msra.mxu0 %v969_v29 }
  0x44   :  { %873 = vmatprep.subr.bf16.mxu0 %v972_v36 }
  0x45   :  { %866 = vmatpush3.bf16.msra.mxu1 %v971_v33 }
  0x46   :  { %511 = vmatmul.mubr.bf16.vlgmr.msra.gmra.mxu0 %v68_v35  ;;  %906 = vmatprep.subr.bf16.mxu1 %v1088_v44  ;;  %v820_v35 = vld [vmem:[%s1156_s4] ss:$0 sm:$0xff] }
  0x47   :  { %874 = vmatpush3.bf16.msra.mxu0 %v973_v39  ;;  %590 = vmatprep.mubr.bf16.mxu0 %v73_v56 }
  0x48   :  { %551 = vmatmul.mubr.bf16.vlgmr.msra.gmra.mxu1 %v70_v41  ;;  %875 = vmatprep.subr.bf16.mxu0 %v974_v42 }
  0x49   :  { %908 = vmatprep.mubr.msk.bf16.mxu1 %vm1089_vm0, %v1088_v44  ;;  %907 = vmatpush3.bf16.msra.mxu1 %v988_v53 }
  0x4a   :  { %912 = vmatprep.subr.bf16.mxu1 %v1088_v44 }
  0x4b   :  { %876 = vmatpush3.bf16.msra.mxu0 %v975_v43 }
  0x4c   :  { %877 = vmatprep.subr.bf16.mxu0 %v976_v45 }
  0x4f   :  { %878 = vmatpush3.bf16.msra.mxu0 %v977_v46 }
  0x50   :  { %879 = vmatprep.subr.bf16.mxu0 %v978_v47  ;;  %909 = vmatmul.mubr.msk.bf16.vlgmr.msra.gmra.mxu1 %vm474_vm1, %v74_v58 }
  0x51   :  { %928 = vmatprep.mubr.msk.bf16.mxu1 %vm1089_vm0, %v1088_v44  ;;  %913 = vmatpush3.bf16.msra.mxu1 %v989_v0 }
  0x52   :  { %914 = vmatprep.subr.bf16.mxu1 %v1088_v44 }
  0x53   :  { %880 = vmatpush3.bf16.msra.mxu0 %v979_v48 }
  0x54   :  { %881 = vmatprep.subr.bf16.mxu0 %v980_v49 }
  0x55   :  { %915 = vmatpush3.bf16.msra.mxu1 %v990_v1 }
  0x56   :  { %916 = vmatprep.subr.bf16.mxu1 %v1088_v44 }
  0x57   :  { %882 = vmatpush3.bf16.msra.mxu0 %v981_v50 }
  0x58   :  { %883 = vmatprep.subr.bf16.mxu0 %v982_v51 }
  0x59   :  { %917 = vmatpush3.bf16.msra.mxu1 %v991_v2 }
  0x5a   :  { %918 = vmatprep.subr.bf16.mxu1 %v1088_v44 }
  0x5b   :  { %884 = vmatpush3.bf16.msra.mxu0 %v983_v52 }
  0x5c   :  { %885 = vmatprep.subr.bf16.mxu0 %v984_v55 }
  0x5d   :  { %919 = vmatpush3.bf16.msra.mxu1 %v992_v3 }
  0x5e   :  { %920 = vmatprep.subr.bf16.mxu1 %v1088_v44 }
  0x5f   :  { %886 = vmatpush3.bf16.msra.mxu0 %v985_v59 }
  0x60   :  { %887 = vmatprep.subr.bf16.mxu0 %v986_v60 }
  0x61   :  { %921 = vmatpush3.bf16.msra.mxu1 %v993_v4 }
  0x62   :  { %922 = vmatprep.subr.bf16.mxu1 %v1088_v44 }
  0x63   :  { %888 = vmatpush3.bf16.msra.mxu0 %v987_v61 }
  0x65   :  { %923 = vmatpush3.bf16.msra.mxu1 %v994_v5 }
  0x66   :  { %591 = vmatmul.mubr.bf16.vlgmr.msra.gmra.mxu0 %v72_v63  ;;  %924 = vmatprep.subr.bf16.mxu1 %v1088_v44 }
  0x69   :  { %925 = vmatpush3.bf16.msra.mxu1 %v995_v6 }
  0x6a   :  { %926 = vmatprep.subr.bf16.mxu1 %v1088_v44 }
  0x6d   :  { %927 = vmatpush3.bf16.msra.mxu1 %v996_v7 }
 0x106   :  { %v845_v8 = vpop.f32.mrf.mxu0 }
 0x108   :  { %v846_v9 = vpop.f32.mrf.mxu0  ;;  %v867_v10 = vpop.f32.mrf.mxu1 }
 0x109   :  { %v847_v20 = vadd.f32 %v846_v9, %v845_v8 }
 0x10a   :  { %v848_v11 = vpop.f32.mrf.mxu0  ;;  %v868_v12 = vpop.f32.mrf.mxu1 }
 0x10b   :  { %v513_v22 = vadd.f32 %v847_v20, %v769_v21  ;;  %v869_v23 = vadd.f32 %v868_v12, %v867_v10 }
 0x10c   :  { %v849_v13 = vpop.f32.mrf.mxu0  ;;  %v870_v14 = vpop.f32.mrf.mxu1 }
 0x10d   :  { %v553_v26 = vadd.f32 %v869_v23, %v513_v22 }
 0x10e   :  { %v871_v15 = vpop.f32.mrf.mxu1 }
 0x110   :  { %v632_v16 = vpop.f32.mrf.mxu1 }
 0x112   :  { %v910_v17 = vpop.f32.mrf.mxu1 }
 0x114   :  { %v635_v18 = vpop.f32.mrf.mxu1 }
 0x116   :  { %v911_v19 = vpop.f32.mrf.mxu1 }
 0x126   :  { %v889_v24 = vpop.f32.mrf.mxu0 }
 0x128   :  { %v890_v25 = vpop.f32.mrf.mxu0 }
 0x129   :  { %v891_v27 = vadd.f32 %v890_v25, %v889_v24 }
 0x12a   :  { %v892_v28 = vpop.f32.mrf.mxu0 }
 0x12b   :  { %v593_v29 = vadd.f32 %v891_v27, %v553_v26 }
 0x12c   :  { %v893_v30 = vpop.f32.mrf.mxu0 }
 0x12d   :  { %v633_v31 = vadd.f32 %v632_v16, %v593_v29 }
 0x12f   :  { %v638_v32 = vmul.f32 0.01, %v633_v31 }
 0x131   :  { %v639_v33 = vmax.f32 %v633_v31, %v638_v32 }
 0x133   :  { %v640_v34 = vpack.c.bf16 %v639_v33, %v639_v33 }
 0x135   :  { %929 = vmatmul.mubr.bf16.vlgmr.msra.gmra.mxu1 %v640_v34 }
 0x1f5   :  { %v746_v36 = vpop.f32.mrf.mxu1 }
 0x1f6   :  { %v747_v37 = vadd.f32 %v820_v35, %v746_v36 }
 0x1f7   :  { %v930_v38 = vpop.f32.mrf.mxu1 }
 0x1f8   :  { %752 = vst [vmem:[#allocation8] sm:$0xff] %v747_v37 }
 0x1f9   :  { %v749_v39 = vpop.f32.mrf.mxu1 }
 0x1fa   :  { %1068 = shalt.err (!%p1065_p5)
}
 0x1fb   :  { %762 = dma.vmem_to_hbm [thread:$0]  %s760_s2, 128, %s1157_s5, [#allocation4]   ;;  %v931_v40 = vpop.f32.mrf.mxu1 }
 0x1fc   :  { %1081 = dma.done.wait [#allocation4], 128  }
 0x1fd   :  { %1082 = vsyncadd [#allocation4], 4294967168 }
 0x1fe   :  { %766 = vsyncpa [#allocation3], 1 }
 0x1ff   :  { %767 = vsyncpa [#allocation6], 1 }
 0x200   :  { %768 = vsyncpa [#allocation4], 1 }

</bundles_post_ra>
